<compile_context>
chip_gen: v6e
topology: v6e:2x2x1
jax: 0.10.0
libtpu: 0.0.40
codegen_flags: <defaults>
</compile_context>

<pallas_src>
import jax
import jax.numpy as jnp
from jax.experimental import pallas as pl
from jax.experimental.pallas import tpu as pltpu


def _make_kernel(B, C, T, V, HID, F, P):
    """Build the fused kernel for static shapes.

    Grid axis f = frame index (0..F-1). Step 0 primes the frame buffer, zeroes
    the accumulator and computes the (tiny) audio-derivative embedding; steps
    f>0 accumulate the flow matmul for frame-pair (f-1, f); the last step
    computes the cosine-embedding loss.
    """
    TV = T * V
    DA = (T - 1) * V  # per-channel audio-derivative length

    def kernel(audio_ref, video_ref, wa_ref, wf_ref, loss_ref,
               prev_ref, acc_ref, avec_ref):
        f = pl.program_id(0)
        last = pl.num_programs(0) - 1

        cur = video_ref[...]                                  # (B, P) f32, frame f

        @pl.when(f == 0)
        def _init():
            acc_ref[...] = jnp.zeros_like(acc_ref)
            # Audio temporal derivative computed in-kernel from a single copy of
            # the audio tensor: d_a[:, c, (t,v)] = a[:, c, t+1, v] - a[:, c, t, v].
            a = audio_ref[...]                                # (B, C, T*V)
            d_a = a[:, :, V:] - a[:, :, :TV - V]              # (B, C, (T-1)*V)
            avec = jnp.zeros((B, HID), jnp.float32)
            for c in range(C):                                # static, small (C dots)
                avec = avec + jnp.dot(
                    d_a[:, c, :].astype(jnp.bfloat16), wa_ref[c],
                    preferred_element_type=jnp.float32)
            avec_ref[...] = avec

        @pl.when(f > 0)
        def _accumulate():
            # Proxy flow = frame difference; diff in f32, MXU operands in bf16.
            d_v = (cur - prev_ref[...]).astype(jnp.bfloat16)  # (B, P)
            acc_ref[...] += jnp.dot(d_v, wf_ref[...],
                                    preferred_element_type=jnp.float32)

        prev_ref[...] = cur                                   # carry frame f to step f+1

        @pl.when(f == last)
        def _finalize():
            a_vec = avec_ref[...]                             # (B, HID)
            f_vec = acc_ref[...]                              # (B, HID)
            eps = jnp.float32(1e-8)
            num = jnp.sum(a_vec * f_vec, axis=-1, keepdims=True)
            na = jnp.sqrt(jnp.sum(a_vec * a_vec, axis=-1, keepdims=True))
            nf = jnp.sqrt(jnp.sum(f_vec * f_vec, axis=-1, keepdims=True))
            den = jnp.maximum(na, eps) * jnp.maximum(nf, eps)
            cos = num * pl.reciprocal(den, approx=True)
            # CosineEmbeddingLoss with target = +1, 'mean' reduction.
            loss_ref[...] = jnp.reshape(jnp.mean(1.0 - cos), (1, 1))

    return kernel


@jax.jit
def correlation_net(audio_feature, gen_video, wa, wf):
    """audio_feature: (B, C, T, V); gen_video: (B, F, C, H, W) -> scalar loss."""
    B, C, T, V = audio_feature.shape
    _, F, VC, HH, WW = gen_video.shape
    P = VC * HH * WW                      # per-frame pixel count
    HID = wa.shape[-1]
    D_AUDIO = C * (T - 1) * V
    D_FLOW = (F - 1) * P
    assert wa.shape[0] == D_AUDIO and wf.shape == (D_FLOW, HID)
    assert P % 128 == 0, "per-frame pixel count must be a multiple of 128 lanes"

    # Metadata-only reshapes: each input is streamed from HBM exactly once.
    audio3 = audio_feature.reshape(B, C, T * V).astype(jnp.float32)
    video2 = gen_video.reshape(B, F * P).astype(jnp.float32)
    video2 = jax.lax.stop_gradient(video2)   # FlowNet runs under no_grad in the reference
    # Weights in bf16 (native MXU input dtype on v5e/v6e/v7x); f32 accumulate.
    wa3 = wa.reshape(C, (T - 1) * V, HID).astype(jnp.bfloat16)
    wf2 = wf.astype(jnp.bfloat16)

    kernel = _make_kernel(B, C, T, V, HID, F, P)

    cost = pl.CostEstimate(
        flops=2 * B * (D_AUDIO + D_FLOW) * HID,
        transcendentals=0,
        bytes_accessed=(audio3.size * 4 + video2.size * 4
                        + wa3.size * 2 + wf2.size * 2 + 4),
    )

    loss = pl.pallas_call(
        kernel,
        out_shape=jax.ShapeDtypeStruct((1, 1), jnp.float32),
        grid_spec=pltpu.PrefetchScalarGridSpec(
            num_scalar_prefetch=0,
            grid=(F,),
            in_specs=[
                # Small audio tensor: resident across all steps (constant index).
                pl.BlockSpec((B, C, T * V), lambda f: (0, 0, 0)),
                # Video: one frame (B, P) per grid step -> read once, pipelined.
                pl.BlockSpec((B, P), lambda f: (0, f)),
                # Audio-encoder weight: small, resident.
                pl.BlockSpec((C, (T - 1) * V, HID), lambda f: (0, 0, 0)),
                # Flow-encoder weight: K-tiled per frame pair, double-buffered;
                # block (f-1) is consumed at step f (clamped at f==0, re-used at f==1).
                pl.BlockSpec((P, HID), lambda f: (jnp.maximum(f - 1, 0), 0)),
            ],
            out_specs=pl.BlockSpec((1, 1), lambda f: (0, 0)),
            scratch_shapes=[
                pltpu.VMEM((B, P), jnp.float32),      # previous frame
                pltpu.VMEM((B, HID), jnp.float32),    # flow-embedding accumulator
                pltpu.VMEM((B, HID), jnp.float32),    # audio embedding
            ],
        ),
        compiler_params=pltpu.CompilerParams(
            dimension_semantics=("arbitrary",),        # sequential reduction over frames
            vmem_limit_bytes=32 * 1024 * 1024,         # explicit: safe on v7x (64 MiB phys)
        ),
        cost_estimate=cost,
    )(audio3, video2, wa3, wf2)
    return loss[0, 0]


def reference(audio_feature, gen_video, wa, wf):
    """Pure-JAX reference with the same bf16-operand / f32-accumulate math."""
    B = audio_feature.shape[0]
    d_a = (audio_feature[:, :, 1:, :] - audio_feature[:, :, :-1, :]).reshape(B, -1)
    d_v = (gen_video[:, 1:] - gen_video[:, :-1]).reshape(B, -1)
    a_vec = jnp.dot(d_a.astype(jnp.bfloat16), wa.astype(jnp.bfloat16),
                    preferred_element_type=jnp.float32)
    f_vec = jnp.dot(d_v.astype(jnp.bfloat16), wf.astype(jnp.bfloat16),
                    preferred_element_type=jnp.float32)
    eps = 1e-8
    cos = jnp.sum(a_vec * f_vec, -1) / (
        jnp.maximum(jnp.linalg.norm(a_vec, axis=-1), eps)
        * jnp.maximum(jnp.linalg.norm(f_vec, axis=-1), eps)
    )
    return jnp.mean(1.0 - cos)


if __name__ == "__main__":
    # Small shapes consistent with the module's forward signature.
    B, C, T, V = 2, 4, 8, 16          # audio_feature: (batch, channels, t, values)
    F, VC, W_IMG, H_IMG = 5, 3, 16, 16  # gen_video: (batch, frames, channels, w, h)
    HIDDEN = 128                      # embedding size of both encoders

    D_AUDIO = C * (T - 1) * V         # 448
    D_FLOW = (F - 1) * VC * W_IMG * H_IMG  # 3072

    key = jax.random.PRNGKey(0)
    k_a, k_v, k_wa, k_wf = jax.random.split(key, 4)

    audio_feature = jax.random.normal(k_a, (B, C, T, V), dtype=jnp.float32)
    gen_video = jax.random.normal(k_v, (B, F, VC, W_IMG, H_IMG), dtype=jnp.float32)

    # Deterministic synthetic encoder weights (AudioEncoderCorr / FlowEncoder
    # stand-ins), stored in bf16 — the MXU-native input dtype.
    wa = (jax.random.normal(k_wa, (D_AUDIO, HIDDEN), dtype=jnp.float32) * 0.02
          ).astype(jnp.bfloat16)
    wf = (jax.random.normal(k_wf, (D_FLOW, HIDDEN), dtype=jnp.float32) * 0.02
          ).astype(jnp.bfloat16)

    loss = correlation_net(audio_feature, gen_video, wa, wf)
    jax.block_until_ready(loss)

    ref = reference(audio_feature, gen_video, wa, wf)
    assert jnp.allclose(loss, ref, rtol=1e-3, atol=1e-3), (loss, ref)

    print("KERNEL_OK")
</pallas_src>

<mosaic_0001>
module attributes {stable_mosaic.version = 11 : i64} {
  func.func @kernel(%arg0: i32, %arg1: memref<2x4x128xf32, #tpu.memory_space<vmem>>, %arg2: memref<2x768xf32, #tpu.memory_space<vmem>>, %arg3: memref<4x112x128xbf16, #tpu.memory_space<vmem>>, %arg4: memref<768x128xbf16, #tpu.memory_space<vmem>>, %arg5: memref<1x1xf32, #tpu.memory_space<vmem>>, %arg6: memref<2x768xf32, #tpu.memory_space<vmem>>, %arg7: memref<2x128xf32, #tpu.memory_space<vmem>>, %arg8: memref<2x128xf32, #tpu.memory_space<vmem>>) attributes {dimension_semantics = [#tpu.dimension_semantics<arbitrary>], iteration_bounds = array<i64: 5>, scalar_prefetch = 0 : i64, scratch_operands = 3 : i64, tpu.core_type = #tpu.core_type<tc>, window_params = [{pipeline_mode = #tpu.pipeline_mode<synchronous>, transform_indices = @transform_0, window_bounds = array<i64: 2, 4, 128>}, {transform_indices = @transform_1, window_bounds = array<i64: 2, 768>}, {pipeline_mode = #tpu.pipeline_mode<synchronous>, transform_indices = @transform_2, window_bounds = array<i64: 4, 112, 128>}, {transform_indices = @transform_3, window_bounds = array<i64: 768, 128>}, {pipeline_mode = #tpu.pipeline_mode<synchronous>, transform_indices = @transform_4, window_bounds = array<i64: 1, 1>}]} {
    %c0 = arith.constant 0 : index
    %c0_0 = arith.constant 0 : index
    %0 = vector.load %arg2[%c0, %c0_0] : memref<2x768xf32, #tpu.memory_space<vmem>>, vector<2x768xf32>
    %c0_i32 = arith.constant 0 : i32
    %1 = arith.cmpi eq, %arg0, %c0_i32 : i32
    %2 = arith.extui %1 : i1 to i32
    %c0_i32_1 = arith.constant 0 : i32
    %3 = arith.cmpi ne, %2, %c0_i32_1 : i32
    scf.if %3 {
      %cst = arith.constant 0.000000e+00 : f32
      %11 = vector.broadcast %cst : f32 to vector<2x128xf32>
      %c0_7 = arith.constant 0 : index
      %c0_8 = arith.constant 0 : index
      %12 = vector.load %arg7[%c0_7, %c0_8] : memref<2x128xf32, #tpu.memory_space<vmem>>, vector<2x128xf32>
      tpu.vector_store %arg7[%c0_7, %c0_8], %11 {strides = array<i32>} : memref<2x128xf32, #tpu.memory_space<vmem>>, vector<2x128xf32>,
      %c0_9 = arith.constant 0 : index
      %c0_10 = arith.constant 0 : index
      %c0_11 = arith.constant 0 : index
      %13 = vector.load %arg1[%c0_9, %c0_10, %c0_11] : memref<2x4x128xf32, #tpu.memory_space<vmem>>, vector<2x4x128xf32>
      %14 = vector.extract_strided_slice %13 {offsets = [0, 0, 16], sizes = [2, 4, 112], strides = [1, 1, 1]} : vector<2x4x128xf32> to vector<2x4x112xf32>
      %15 = vector.extract_strided_slice %13 {offsets = [0, 0, 0], sizes = [2, 4, 112], strides = [1, 1, 1]} : vector<2x4x128xf32> to vector<2x4x112xf32>
      %16 = arith.subf %14, %15 : vector<2x4x112xf32>
      %cst_12 = arith.constant 0.000000e+00 : f32
      %17 = vector.broadcast %cst_12 : f32 to vector<2x128xf32>
      %18 = vector.extract_strided_slice %16 {offsets = [0, 0, 0], sizes = [2, 1, 112], strides = [1, 1, 1]} : vector<2x4x112xf32> to vector<2x1x112xf32>
      %19 = vector.shape_cast %18 : vector<2x1x112xf32> to vector<2x112xf32>
      %20 = arith.truncf %19 : vector<2x112xf32> to vector<2x112xbf16>
      %c0_13 = arith.constant 0 : index
      %c0_14 = arith.constant 0 : index
      %c0_15 = arith.constant 0 : index
      %21 = vector.load %arg3[%c0_13, %c0_14, %c0_15] : memref<4x112x128xbf16, #tpu.memory_space<vmem>>, vector<1x112x128xbf16>
      %22 = vector.shape_cast %21 : vector<1x112x128xbf16> to vector<112x128xbf16>
      %cst_16 = arith.constant dense<0.000000e+00> : vector<2x128xf32>
      %23 = tpu.matmul %20, %22, %cst_16 {dimension_numbers = #tpu.dot_dimension_numbers<[1], [0], [0], [1], [0, 0, 1, 1], [], []>} : vector<2x112xbf16>, vector<112x128xbf16>, vector<2x128xf32> -> vector<2x128xf32>
      %24 = arith.addf %17, %23 : vector<2x128xf32>
      %25 = vector.extract_strided_slice %16 {offsets = [0, 1, 0], sizes = [2, 1, 112], strides = [1, 1, 1]} : vector<2x4x112xf32> to vector<2x1x112xf32>
      %26 = vector.shape_cast %25 : vector<2x1x112xf32> to vector<2x112xf32>
      %27 = arith.truncf %26 : vector<2x112xf32> to vector<2x112xbf16>
      %c1 = arith.constant 1 : index
      %c0_17 = arith.constant 0 : index
      %c0_18 = arith.constant 0 : index
      %28 = vector.load %arg3[%c1, %c0_17, %c0_18] : memref<4x112x128xbf16, #tpu.memory_space<vmem>>, vector<1x112x128xbf16>
      %29 = vector.shape_cast %28 : vector<1x112x128xbf16> to vector<112x128xbf16>
      %cst_19 = arith.constant dense<0.000000e+00> : vector<2x128xf32>
      %30 = tpu.matmul %27, %29, %cst_19 {dimension_numbers = #tpu.dot_dimension_numbers<[1], [0], [0], [1], [0, 0, 1, 1], [], []>} : vector<2x112xbf16>, vector<112x128xbf16>, vector<2x128xf32> -> vector<2x128xf32>
      %31 = arith.addf %24, %30 : vector<2x128xf32>
      %32 = vector.extract_strided_slice %16 {offsets = [0, 2, 0], sizes = [2, 1, 112], strides = [1, 1, 1]} : vector<2x4x112xf32> to vector<2x1x112xf32>
      %33 = vector.shape_cast %32 : vector<2x1x112xf32> to vector<2x112xf32>
      %34 = arith.truncf %33 : vector<2x112xf32> to vector<2x112xbf16>
      %c2 = arith.constant 2 : index
      %c0_20 = arith.constant 0 : index
      %c0_21 = arith.constant 0 : index
      %35 = vector.load %arg3[%c2, %c0_20, %c0_21] : memref<4x112x128xbf16, #tpu.memory_space<vmem>>, vector<1x112x128xbf16>
      %36 = vector.shape_cast %35 : vector<1x112x128xbf16> to vector<112x128xbf16>
      %cst_22 = arith.constant dense<0.000000e+00> : vector<2x128xf32>
      %37 = tpu.matmul %34, %36, %cst_22 {dimension_numbers = #tpu.dot_dimension_numbers<[1], [0], [0], [1], [0, 0, 1, 1], [], []>} : vector<2x112xbf16>, vector<112x128xbf16>, vector<2x128xf32> -> vector<2x128xf32>
      %38 = arith.addf %31, %37 : vector<2x128xf32>
      %39 = vector.extract_strided_slice %16 {offsets = [0, 3, 0], sizes = [2, 1, 112], strides = [1, 1, 1]} : vector<2x4x112xf32> to vector<2x1x112xf32>
      %40 = vector.shape_cast %39 : vector<2x1x112xf32> to vector<2x112xf32>
      %41 = arith.truncf %40 : vector<2x112xf32> to vector<2x112xbf16>
      %c3 = arith.constant 3 : index
      %c0_23 = arith.constant 0 : index
      %c0_24 = arith.constant 0 : index
      %42 = vector.load %arg3[%c3, %c0_23, %c0_24] : memref<4x112x128xbf16, #tpu.memory_space<vmem>>, vector<1x112x128xbf16>
      %43 = vector.shape_cast %42 : vector<1x112x128xbf16> to vector<112x128xbf16>
      %cst_25 = arith.constant dense<0.000000e+00> : vector<2x128xf32>
      %44 = tpu.matmul %41, %43, %cst_25 {dimension_numbers = #tpu.dot_dimension_numbers<[1], [0], [0], [1], [0, 0, 1, 1], [], []>} : vector<2x112xbf16>, vector<112x128xbf16>, vector<2x128xf32> -> vector<2x128xf32>
      %45 = arith.addf %38, %44 : vector<2x128xf32>
      %c0_26 = arith.constant 0 : index
      %c0_27 = arith.constant 0 : index
      %46 = vector.load %arg8[%c0_26, %c0_27] : memref<2x128xf32, #tpu.memory_space<vmem>>, vector<2x128xf32>
      tpu.vector_store %arg8[%c0_26, %c0_27], %45 {strides = array<i32>} : memref<2x128xf32, #tpu.memory_space<vmem>>, vector<2x128xf32>,
    } else {
    }
    %c0_i32_2 = arith.constant 0 : i32
    %4 = arith.cmpi sgt, %arg0, %c0_i32_2 : i32
    %5 = arith.extui %4 : i1 to i32
    %c0_i32_3 = arith.constant 0 : i32
    %6 = arith.cmpi ne, %5, %c0_i32_3 : i32
    scf.if %6 {
      %c0_7 = arith.constant 0 : index
      %c0_8 = arith.constant 0 : index
      %11 = vector.load %arg6[%c0_7, %c0_8] : memref<2x768xf32, #tpu.memory_space<vmem>>, vector<2x768xf32>
      %12 = arith.subf %0, %11 : vector<2x768xf32>
      %13 = arith.truncf %12 : vector<2x768xf32> to vector<2x768xbf16>
      %c0_9 = arith.constant 0 : index
      %c0_10 = arith.constant 0 : index
      %14 = vector.load %arg7[%c0_9, %c0_10] : memref<2x128xf32, #tpu.memory_space<vmem>>, vector<2x128xf32>
      %c0_11 = arith.constant 0 : index
      %c0_12 = arith.constant 0 : index
      %15 = vector.load %arg4[%c0_11, %c0_12] : memref<768x128xbf16, #tpu.memory_space<vmem>>, vector<768x128xbf16>
      %cst = arith.constant dense<0.000000e+00> : vector<2x128xf32>
      %16 = tpu.matmul %13, %15, %cst {dimension_numbers = #tpu.dot_dimension_numbers<[1], [0], [0], [1], [0, 0, 1, 1], [], []>} : vector<2x768xbf16>, vector<768x128xbf16>, vector<2x128xf32> -> vector<2x128xf32>
      %17 = arith.addf %14, %16 : vector<2x128xf32>
      %c0_13 = arith.constant 0 : index
      %c0_14 = arith.constant 0 : index
      %18 = vector.load %arg7[%c0_13, %c0_14] : memref<2x128xf32, #tpu.memory_space<vmem>>, vector<2x128xf32>
      tpu.vector_store %arg7[%c0_13, %c0_14], %17 {strides = array<i32>} : memref<2x128xf32, #tpu.memory_space<vmem>>, vector<2x128xf32>,
    } else {
    }
    %c0_4 = arith.constant 0 : index
    %c0_5 = arith.constant 0 : index
    %7 = vector.load %arg6[%c0_4, %c0_5] : memref<2x768xf32, #tpu.memory_space<vmem>>, vector<2x768xf32>
    tpu.vector_store %arg6[%c0_4, %c0_5], %0 {strides = array<i32>} : memref<2x768xf32, #tpu.memory_space<vmem>>, vector<2x768xf32>,
    %c4_i32 = arith.constant 4 : i32
    %8 = arith.cmpi eq, %arg0, %c4_i32 : i32
    %9 = arith.extui %8 : i1 to i32
    %c0_i32_6 = arith.constant 0 : i32
    %10 = arith.cmpi ne, %9, %c0_i32_6 : i32
    scf.if %10 {
      %c0_7 = arith.constant 0 : index
      %c0_8 = arith.constant 0 : index
      %11 = vector.load %arg8[%c0_7, %c0_8] : memref<2x128xf32, #tpu.memory_space<vmem>>, vector<2x128xf32>
      %c0_9 = arith.constant 0 : index
      %c0_10 = arith.constant 0 : index
      %12 = vector.load %arg7[%c0_9, %c0_10] : memref<2x128xf32, #tpu.memory_space<vmem>>, vector<2x128xf32>
      %13 = arith.mulf %11, %12 : vector<2x128xf32>
      %cst = arith.constant dense<0.000000e+00> : vector<2xf32>
      %14 = vector.multi_reduction <add>, %13, %cst [1] : vector<2x128xf32> to vector<2xf32>
      %15 = vector.shape_cast %14 : vector<2xf32> to vector<2x1xf32>
      %16 = arith.mulf %11, %11 : vector<2x128xf32>
      %cst_11 = arith.constant dense<0.000000e+00> : vector<2xf32>
      %17 = vector.multi_reduction <add>, %16, %cst_11 [1] : vector<2x128xf32> to vector<2xf32>
      %18 = vector.shape_cast %17 : vector<2xf32> to vector<2x1xf32>
      %19 = math.sqrt %18 : vector<2x1xf32>
      %20 = arith.mulf %12, %12 : vector<2x128xf32>
      %cst_12 = arith.constant dense<0.000000e+00> : vector<2xf32>
      %21 = vector.multi_reduction <add>, %20, %cst_12 [1] : vector<2x128xf32> to vector<2xf32>
      %22 = vector.shape_cast %21 : vector<2xf32> to vector<2x1xf32>
      %23 = math.sqrt %22 : vector<2x1xf32>
      %cst_13 = arith.constant 9.99999993E-9 : f32
      %24 = vector.broadcast %cst_13 : f32 to vector<2x1xf32>
      %25 = arith.maximumf %19, %24 : vector<2x1xf32>
      %cst_14 = arith.constant 9.99999993E-9 : f32
      %26 = vector.broadcast %cst_14 : f32 to vector<2x1xf32>
      %27 = arith.maximumf %23, %26 : vector<2x1xf32>
      %28 = arith.mulf %25, %27 : vector<2x1xf32>
      %29 = tpu.reciprocal %28 {approx = true} : vector<2x1xf32> -> vector<2x1xf32>
      %30 = arith.mulf %15, %29 : vector<2x1xf32>
      %cst_15 = arith.constant 1.000000e+00 : f32
      %31 = vector.broadcast %cst_15 : f32 to vector<2x1xf32>
      %32 = arith.subf %31, %30 : vector<2x1xf32>
      %33 = vector.shape_cast %32 : vector<2x1xf32> to vector<1x2x1xf32>
      %cst_16 = arith.constant dense<0.000000e+00> : vector<1xf32>
      %34 = vector.multi_reduction <add>, %33, %cst_16 [1, 2] : vector<1x2x1xf32> to vector<1xf32>
      %35 = vector.shape_cast %34 : vector<1xf32> to vector<1x1x1xf32>
      %36 = vector.extract %35[0, 0, 0] : f32 from vector<1x1x1xf32>
      %cst_17 = arith.constant 2.000000e+00 : f32
      %37 = arith.divf %36, %cst_17 : f32
      %38 = vector.broadcast %37 : f32 to vector<1x1xf32>
      %c0_18 = arith.constant 0 : index
      %c0_19 = arith.constant 0 : index
      %39 = vector.load %arg5[%c0_18, %c0_19] : memref<1x1xf32, #tpu.memory_space<vmem>>, vector<1x1xf32>
      tpu.vector_store %arg5[%c0_18, %c0_19], %38 {strides = array<i32>} : memref<1x1xf32, #tpu.memory_space<vmem>>, vector<1x1xf32>,
    } else {
    }
    return
  }
  func.func @transform_0(%arg0: i32) -> (i32, i32, i32) {
    %c0_i32 = arith.constant 0 : i32
    %c0_i32_0 = arith.constant 0 : i32
    %c0_i32_1 = arith.constant 0 : i32
    %c0_i32_2 = arith.constant 0 : i32
    return %c0_i32, %c0_i32_0, %c0_i32_1 : i32, i32, i32
  }
  func.func @transform_1(%arg0: i32) -> (i32, i32) {
    %c0_i32 = arith.constant 0 : i32
    %c0_i32_0 = arith.constant 0 : i32
    return %c0_i32, %arg0 : i32, i32
  }
  func.func @transform_2(%arg0: i32) -> (i32, i32, i32) {
    %c0_i32 = arith.constant 0 : i32
    %c0_i32_0 = arith.constant 0 : i32
    %c0_i32_1 = arith.constant 0 : i32
    %c0_i32_2 = arith.constant 0 : i32
    return %c0_i32, %c0_i32_0, %c0_i32_1 : i32, i32, i32
  }
  func.func @transform_3(%arg0: i32) -> (i32, i32) {
    %c1_i32 = arith.constant 1 : i32
    %0 = arith.subi %arg0, %c1_i32 : i32
    %c0_i32 = arith.constant 0 : i32
    %1 = arith.maxsi %0, %c0_i32 : i32
    %c0_i32_0 = arith.constant 0 : i32
    %c0_i32_1 = arith.constant 0 : i32
    return %1, %c0_i32_0 : i32, i32
  }
  func.func @transform_4(%arg0: i32) -> (i32, i32) {
    %c0_i32 = arith.constant 0 : i32
    %c0_i32_0 = arith.constant 0 : i32
    %c0_i32_1 = arith.constant 0 : i32
    return %c0_i32, %c0_i32_0 : i32, i32
  }
}

</mosaic_0001>

<bundles_post_ra>
// kernel: correlation_net.1
= control target key start
LH: loop header
LB: loop body
LE: loop exit
PB: predicated region body
PF: predicated region fallthrough
CT: control target
= control target key end

     0   :  { %9 = vsyncpa [#allocation6], 0  ;;  %s2252_s0 = inlined_call_operand.vmem [shape: f32[2,4,128], index: 0, kind: input, shape index: {}]   ;;  %s2253_s1 = inlined_call_operand.vmem [shape: f32[2,3840], index: 1, kind: input, shape index: {}]   ;;  %s2254_s2 = inlined_call_operand.vmem [shape: bf16[4,112,128], index: 2, kind: input, shape index: {}]   ;;  %s2255_s3 = inlined_call_operand.hbm [shape: bf16[3072,128], index: 3, kind: input, shape index: {}]   ;;  %s2256_s4 = inlined_call_operand.hbm [shape: f32[1,1], index: 4, kind: output, shape index: {}]  }
   0x1   :  { %11 = vsyncpa [#allocation6 + $0x1], 0 }
   0x2   :  { %12 = vsyncpa [#allocation7], 0  ;;  %s1946_s15 = smov 0   ;;  %s1948_s16 = smov 0  }
   0x3   :  { %s1950_s17 = smov 0   ;;  %s1952_s18 = smov 0  }
   0x4 LB: > { %s1965_s19 = sadd.s32 4294967295, %s1910_s18   ;;  %s1968_s20 = sadd.s32 1, %s1910_s18   ;;  %s1910_s18 = sphi %s1952_s18, %s2264_s18   ;;  %s1906_s17 = sphi %s1950_s17, %s2263_s17   ;;  %s1902_s16 = sphi %s1948_s16, %s2262_s16   ;;  %s1898_s15 = sphi %s1946_s15, %s2261_s15  }
   0x5   : > { %p91_p0 = scmp.gt.s32.totalorder %s1965_s19, 0  ;;  %s1374_s21 = sadd.s32 4294967295, %s1968_s20 }
   0x6   : > { %p94_p1 = scmp.gt.s32.totalorder %s1374_s21, 0  ;;  %s99_s22 = sadd.s32 1, %s1906_s17 }
   0x7   : > { %s92_s23 = scalar_select %p91_p0, %s1965_s19, 0 }
   0x8   : > { %s2266_s21 = smov (!%p94_p1, %s1374_s21), 0  ;;  %p106_p2 = scmp.ne.s32.totalorder %s1906_s17, %s1902_s16 }
   0x9   : > { %p107_p3 = scmp.eq.s32.totalorder %s1910_s18, 0  ;;  %s96_s24 = ssub.s32 %s92_s23, %s2266_s21 }
   0xa   : > { %p112_p4 = scmp.ne.s32.totalorder %s1902_s16, %s1898_s15  ;;  %p97_p5 = scmp.eq.s32.totalorder %s96_s24, 0 }
   0xb   : > { %p108_p6 = por %p107_p3, %p106_p2  ;;  %p113_p7 = scmp.eq.s32.totalorder %s1965_s19, 0 }
   0xc   : > { %s1980_s25 = scalar_select %p97_p5, %s1906_s17, %s99_s22  }
   0xd   : > { %p1982_p8 = por %p113_p7, %p112_p4  ;;  %p1695_p9 = scmp.lt.s32.totalorder %s1910_s18, 5 }
   0xe   : > { %s172_s27 = sand.u32 1, %s1906_s17   ;;  %s1510_s28 = smul.u32 6144, %s92_s23 }
   0xf   : > { %s2258_s26 = scalar_select %p1982_p8, 1, 0 }
  0x10   : > { %s1681_s29 = smul.u32 384, %s172_s27  ;;  %s1991_s6 = scalar_lea.hbm %s2255_s3, %s1510_s28 }
  0x11   : > { %p1993_p10 = pnand %p1695_p9, %p108_p6  ;;  %s1999_s10 = scalar_lea.sflag [#allocation6], %s172_s27 }
  0x12   : > { %s176_s8 = scalar_lea.vmem [#allocation5], %s1681_s29  ;;  %s1820_s11 = scalar_lea.hbm %s1991_s6, 6144 }
  0x13   : > { %s186_s9 = sshll.u32 %s176_s8, 4  ;;  %p1821_p11 = scmp.ne.s32.totalorder %s1991_s6, %s1820_s11  ;;  %s1997_s9 = int_to_ptr.vmem [resolvable:$true] %s186_s9 }
  0x14   : > { %p1822_p12 = pneg %p1993_p10  ;;  %s1825_s14 = scalar_lea.hbm %s2255_s3, 24576 }
  0x15   : > { %p1826_p1 = scmp.lt.s32.totalorder %s1991_s6, %s2255_s3  ;;  %p1827_p2 = scmp.lt.s32.totalorder %s1825_s14, %s1820_s11 }
  0x16   : > { %p1823_p13 = pnand %p1822_p12, %p1821_p11 }
  0x17   : > { %p1828_p3 = por %p1827_p2, %p1826_p1 }
  0x18   : > { %p1824_p0 = pneg %p1823_p13 }
  0x1a   : > { %p1829_p4 = pnand %p1828_p3, %p1824_p0 }
  0x1c   : > { %1832 = shalt.err (!%p1829_p4)
}
  0x1d   : > { %s1833_s22 = scalar_lea.vmem %s1997_s9, 6144  ;;  %s1912_s23 = smov [#allocation5]  }
  0x1e   : > { %p1834_p5 = scmp.ne.s32.totalorder %s1997_s9, %s1833_s22  ;;  %s1838_s24 = sshll.u32 %s1912_s23, 4  ;;  %s1839_s24 = int_to_ptr.vmem [resolvable:$false] %s1838_s24 }
  0x1f   : > { %s1840_s27 = scalar_lea.vmem %s1839_s24, 12288  ;;  %p1841_p9 = scmp.lt.s32.totalorder %s1997_s9, %s1839_s24 }
  0x20   : > { %p1836_p6 = pnand %p1834_p5, %p1822_p12  ;;  %p1842_p11 = scmp.lt.s32.totalorder %s1840_s27, %s1833_s22 }
  0x22   : > { %p1837_p7 = pneg %p1836_p6  ;;  %p1843_p13 = por %p1842_p11, %p1841_p9 }
  0x24   : > { %p1844_p8 = pnand %p1843_p13, %p1837_p7 }
  0x26   : > { %1847 = shalt.err (!%p1844_p8)
}
  0x27   : > { %s1913_s28 = smov 64   ;;  %s1914_s29 = smov 4  }
  0x28   : > { %1694 = dma.hbm_to_vmem [thread:$0]  (!%p1993_p10), %s1991_s6, 6144, %s1997_s9, %s1999_s10, %s1913_s28, %s1913_s28, %s1914_s29  }
  0x29   : > { %p1379_p12 = scmp.ge.s32.totalorder %s1910_s18, 1  ;;  %p194_p0 = scmp.lt.s32.totalorder %s1910_s18, 6 }
  0x2b   : > { %p195_p1 = pnand %p1379_p12, %p194_p0 }
  0x2c   : > { %s200_s30 = sand.u32 (!%p195_p1), 1, %s1902_s16   ;;  %p2260_p8 = scmp.ne.s32.totalorder (!%p195_p1), %s2258_s26, 0 }
  0x2d   : > { %198 = sbr.rel (%p195_p1) target bundleno = 1222 (0x4c6), region = 36  ;;  %s201_s8 = scalar_lea.sflag (!%p195_p1), [#allocation6], %s200_s30 }
  0x2e   : > { %s1682_s5 = smul.u32 (!%p195_p1), 384, %s200_s30 }
  0x30   : > { %s2023_s11 = scalar_lea.vmem (!%p195_p1), [#allocation5], %s1682_s5 }
  0x32   : > { %1889 = dma.done.wait (%p2260_p8), %s201_s8, 6144  }
  0x33   : > { %1891 = vsyncadd (%p2260_p8), %s201_s8, 4294961152  ;;  %s229_s12 = smul.u32 6, %s1965_s19  ;;  %p1381_p10 = scmp.ne.s32.totalorder %s1965_s19, 0 }
  0x34   : > { %s1915_s26 = smov (!%p1381_p10), 16   ;;  %s1918_s5 = smov (!%p1381_p10), 112  }
  0x35   : > { %p230_p2 = scmp.lt.s32.totalorder %s229_s12, 29 }
  0x36   : > { %245 = sbr.rel (%p1381_p10) target bundleno = 534 (0x216), region = 44 }
  0x37   : > { %s2268_s12 = smov (!%p230_p2, %s229_s12), 29 }
  0x38   : > { %s1380_s6 = sshll.u32 %s2268_s12, 1 }
  0x39   : > { %s233_s9 = scalar_lea.vmem %s2253_s1, %s1380_s6 }
  0x3a   : > { %v2033_v0 = vld [vmem:[%s233_s9] sm:$0xff]  ;;  %v2035_v1 = vld [vmem:[%s233_s9 + $0x8] sm:$0xf] }
  0x3b   : > { %v247_v2 = vld [vmem:[%s2252_s0] sm:$0xf]  ;;  %v248_v3 = vld [vmem:[%s2252_s0 + $0x4] sm:$0xf]  ;;  %v1738_v4 = vld [vmem:[%s2254_s2 + $0x68] sm:$0xff]   ;;  %v1916_v6 = vmov 0.0  }
  0x3c   : > { %251 = vrot.lane.b32.xlu0 %v247_v2, %s1915_s26  ;;  %v1740_v5 = vld [vmem:[%s2254_s2 + $0x30] sm:$0xff]   ;;  %246 = vst [vmem:[#allocation3] sm:$0x3] %v1916_v6  ;;  %1609 = vmatprep.subr.bf16.mxu0 %v1916_v6  ;;  %v1739_v7 = vld [vmem:[%s2254_s2 + $0x60] sm:$0xff]   ;;  %v1742_v8 = vld [vmem:[%s2254_s2 + $0x28] sm:$0xff]   ;;  %vm1917_vm0 = vmmov 0  }
  0x3d   : > { %1627 = vmatprep.subr.bf16.mxu1 %v1916_v6  ;;  %1610 = vmatpush3.bf16.msra.mxu0 %v1738_v4  ;;  %v1741_v9 = vld [vmem:[%s2254_s2 + $0x58] sm:$0xff]   ;;  %v1744_v10 = vld [vmem:[%s2254_s2 + $0x20] sm:$0xff]   ;;  %v1743_v11 = vld [vmem:[%s2254_s2 + $0x50] sm:$0xff]   ;;  %vm295_vm1 = vcmask 1041409   ;;  %vm342_vm2 = vcmask 916480  }
  0x3e   : > { %1628 = vmatpush3.bf16.msra.mxu1 %v1740_v5  ;;  %1611 = vmatprep.subr.bf16.mxu0 %v1916_v6  ;;  %v1746_v12 = vld [vmem:[%s2254_s2 + $0x18] sm:$0xff]   ;;  %v1745_v13 = vld [vmem:[%s2254_s2 + $0x48] sm:$0xff]   ;;  %v1748_v14 = vld [vmem:[%s2254_s2 + $0x10] sm:$0xff]  }
  0x3f   : > { %1629 = vmatprep.subr.bf16.mxu1 %v1916_v6  ;;  %v1747_v15 = vld [vmem:[%s2254_s2 + $0x40] sm:$0xff]   ;;  %v1750_v16 = vld [vmem:[%s2254_s2 + $0x8] sm:$0xff]   ;;  %v1749_v17 = vld [vmem:[%s2254_s2 + $0x38] sm:$0xff]   ;;  %1623 = vmatprep.mubr.msk.bf16.mxu0 %vm1917_vm0, %v1916_v6 }
  0x40   : > { %253 = vrot.lane.b32.xlu0 %v248_v3, %s1915_s26  ;;  %v1751_v18 = vld [vmem:[%s2254_s2] sm:$0xff]   ;;  %1641 = vmatprep.mubr.msk.bf16.mxu1 %vm1917_vm0, %v1916_v6  ;;  %v1753_v43 = vld [vmem:[%s2254_s2 + $0x98] sm:$0xff]   ;;  %v1755_v46 = vld [vmem:[%s2254_s2 + $0x90] sm:$0xff]  }
  0x41   : > { %1612 = vmatpush3.bf16.msra.mxu0 %v1739_v7  ;;  %v1752_v41 = vld [vmem:[%s2254_s2 + $0xa0] sm:$0xff]   ;;  %v1754_v44 = vld [vmem:[%s2254_s2 + $0xd8] sm:$0xff]   ;;  %v1756_v47 = vld [vmem:[%s2254_s2 + $0xd0] sm:$0xff]  }
  0x42   : > { %1630 = vmatpush3.bf16.msra.mxu1 %v1742_v8  ;;  %1613 = vmatprep.subr.bf16.mxu0 %v1916_v6  ;;  %v1757_v48 = vld [vmem:[%s2254_s2 + $0x88] sm:$0xff]   ;;  %v1759_v50 = vld [vmem:[%s2254_s2 + $0x80] sm:$0xff]   ;;  %v1761_v52 = vld [vmem:[%s2254_s2 + $0x78] sm:$0xff]  }
  0x43   : > { %1631 = vmatprep.subr.bf16.mxu1 %v1916_v6  ;;  %v1758_v49 = vld [vmem:[%s2254_s2 + $0xc8] sm:$0xff]   ;;  %v1760_v51 = vld [vmem:[%s2254_s2 + $0xc0] sm:$0xff]   ;;  %v1762_v53 = vld [vmem:[%s2254_s2 + $0xb8] sm:$0xff]  }
  0x44   : > { %v1763_v54 = vld [vmem:[%s2254_s2 + $0x70] sm:$0xff]   ;;  %v1765_v56 = vld [vmem:[%s2254_s2 + $0xa8] sm:$0xff]  }
  0x45   : > { %1614 = vmatpush3.bf16.msra.mxu0 %v1741_v9  ;;  %v1764_v55 = vld [vmem:[%s2254_s2 + $0xb0] sm:$0xff]  }
  0x46   : > { %1632 = vmatpush3.bf16.msra.mxu1 %v1744_v10  ;;  %1615 = vmatprep.subr.bf16.mxu0 %v1916_v6 }
  0x47   : > { %1633 = vmatprep.subr.bf16.mxu1 %v1916_v6 }
  0x49   : > { %1616 = vmatpush3.bf16.msra.mxu0 %v1743_v11 }
  0x4a   : > { %1634 = vmatpush3.bf16.msra.mxu1 %v1746_v12  ;;  %1617 = vmatprep.subr.bf16.mxu0 %v1916_v6 }
  0x4b   : > { %1635 = vmatprep.subr.bf16.mxu1 %v1916_v6 }
  0x4d   : > { %1618 = vmatpush3.bf16.msra.mxu0 %v1745_v13 }
  0x4e   : > { %1636 = vmatpush3.bf16.msra.mxu1 %v1748_v14  ;;  %1619 = vmatprep.subr.bf16.mxu0 %v1916_v6 }
  0x4f   : > { %1637 = vmatprep.subr.bf16.mxu1 %v1916_v6 }
  0x51   : > { %1620 = vmatpush3.bf16.msra.mxu0 %v1747_v15 }
  0x52   : > { %1638 = vmatpush3.bf16.msra.mxu1 %v1750_v16  ;;  %1621 = vmatprep.subr.bf16.mxu0 %v1916_v6 }
  0x53   : > { %1639 = vmatprep.subr.bf16.mxu1 %v1916_v6 }
  0x55   : > { %1622 = vmatpush3.bf16.msra.mxu0 %v1749_v17 }
  0x56   : > { %1645 = vmatprep.subr.bf16.mxu0 %v1916_v6  ;;  %1640 = vmatpush3.bf16.msra.mxu1 %v1751_v18 }
  0x57   : > { %1663 = vmatprep.subr.bf16.mxu1 %v1916_v6 }
  0xae   : > { %v252_v19 = vpop.permute.xlu0 %251 }
  0xaf   : > { %v257_v20 = vsub.f32 %v247_v2, %v252_v19 }
  0xb1   : > { %v259_v21 = vpack.c.bf16 %v257_v20, %v257_v20 }
  0xb2   : > { %v254_v22 = vpop.permute.xlu0 %253 }
  0xb3   : > { %v292_v23 = vunpack.c.l.b16 %v259_v21  ;;  %v258_v24 = vsub.f32 %v248_v3, %v254_v22 }
  0xb5   : > { %v260_v25 = vpack.c.bf16 %v258_v24, %v258_v24  ;;  %v294_v27 = vrot.slane %v292_v23, 1  ;;  %v491_v29 = vrot.slane %v292_v23, 2  ;;  %v598_v37 = vrot.slane %v292_v23, 3 }
  0xb7   : > { %v293_v26 = vunpack.c.l.b16 %v260_v25 }
  0xb9   : > { %v296_v28 = vsel %vm295_vm1, %v293_v26, %v294_v27  ;;  %v492_v30 = vrot.slane %v293_v26, 1  ;;  %v386_v31 = vrot.slane %v293_v26, 7  ;;  %v599_v35 = vrot.slane %v293_v26, 2 }
  0xba   : > { %v297_v32 = vpack.c.b16 %v296_v28, %v296_v28 }
  0xbb   : > { %v493_v33 = vsel %vm295_vm1, %v492_v30, %v491_v29  ;;  %v387_v34 = vsel %vm295_vm1, %v386_v31, %v292_v23  ;;  %v600_v39 = vsel %vm295_vm1, %v599_v35, %v598_v37 }
  0xbc   : > { %298 = vrot.lane.b32.xlu1 %v297_v32, %s1918_s5  ;;  %v494_v36 = vpack.c.b16 %v493_v33, %v493_v33  ;;  %v388_v38 = vpack.c.b16 %v387_v34, %v387_v34  ;;  %v601_v40 = vpack.c.b16 %v600_v39, %v600_v39 }
  0xbe   : > { %495 = vrot.lane.b32.xlu0 %v494_v36, %s1918_s5 }
  0xc0   : > { %389 = vrot.lane.b32.xlu1 %v388_v38, %s1918_s5 }
  0xc4   : > { %602 = vrot.lane.b32.xlu1 %v601_v40, %s1918_s5 }
 0x12e   : > { %v299_v42 = vpop.permute.xlu1 %298 }
 0x12f   : > { %1624 = vmatmul.mubr.msk.bf16.vlgmr.msra.gmra.mxu0 %vm342_vm2, %v299_v42 }
 0x130   : > { %1646 = vmatpush3.bf16.msra.mxu0 %v1752_v41  ;;  %1659 = vmatprep.mubr.msk.bf16.mxu0 %vm1917_vm0, %v1916_v6  ;;  %v496_v57 = vpop.permute.xlu0 %495 }
 0x131   : > { %1647 = vmatprep.subr.bf16.mxu0 %v1916_v6 }
 0x132   : > { %v390_v45 = vpop.permute.xlu1 %389 }
 0x133   : > { %1642 = vmatmul.mubr.msk.bf16.vlgmr.msra.gmra.mxu1 %vm342_vm2, %v390_v45 }
 0x134   : > { %1648 = vmatpush3.bf16.msra.mxu0 %v1753_v43  ;;  %1664 = vmatpush3.bf16.msra.mxu1 %v1754_v44 }
 0x135   : > { %1649 = vmatprep.subr.bf16.mxu0 %v1916_v6  ;;  %1665 = vmatprep.subr.bf16.mxu1 %v1916_v6 }
 0x136   : > { %1677 = vmatprep.mubr.msk.bf16.mxu1 %vm1917_vm0, %v1916_v6  ;;  %v603_v58 = vpop.permute.xlu1 %602 }
 0x138   : > { %1650 = vmatpush3.bf16.msra.mxu0 %v1755_v46  ;;  %1666 = vmatpush3.bf16.msra.mxu1 %v1756_v47 }
 0x139   : > { %1651 = vmatprep.subr.bf16.mxu0 %v1916_v6  ;;  %1667 = vmatprep.subr.bf16.mxu1 %v1916_v6 }
 0x13c   : > { %1652 = vmatpush3.bf16.msra.mxu0 %v1757_v48  ;;  %1668 = vmatpush3.bf16.msra.mxu1 %v1758_v49 }
 0x13d   : > { %1653 = vmatprep.subr.bf16.mxu0 %v1916_v6  ;;  %1669 = vmatprep.subr.bf16.mxu1 %v1916_v6 }
 0x140   : > { %1654 = vmatpush3.bf16.msra.mxu0 %v1759_v50  ;;  %1670 = vmatpush3.bf16.msra.mxu1 %v1760_v51 }
 0x141   : > { %1655 = vmatprep.subr.bf16.mxu0 %v1916_v6  ;;  %1671 = vmatprep.subr.bf16.mxu1 %v1916_v6 }
 0x144   : > { %1656 = vmatpush3.bf16.msra.mxu0 %v1761_v52  ;;  %1672 = vmatpush3.bf16.msra.mxu1 %v1762_v53 }
 0x145   : > { %1657 = vmatprep.subr.bf16.mxu0 %v1916_v6  ;;  %1673 = vmatprep.subr.bf16.mxu1 %v1916_v6 }
 0x148   : > { %1658 = vmatpush3.bf16.msra.mxu0 %v1763_v54  ;;  %1674 = vmatpush3.bf16.msra.mxu1 %v1764_v55 }
 0x149   : > { %1675 = vmatprep.subr.bf16.mxu1 %v1916_v6 }
 0x14b   : > { %1660 = vmatmul.mubr.msk.bf16.vlgmr.msra.gmra.mxu0 %vm342_vm2, %v496_v57 }
 0x14c   : > { %1676 = vmatpush3.bf16.msra.mxu1 %v1765_v56 }
 0x14f   : > { %1678 = vmatmul.mubr.msk.bf16.vlgmr.msra.gmra.mxu1 %vm342_vm2, %v603_v58 }
 0x1ef   : > { %v380_v59 = vpop.f32.mrf.mxu0 }
 0x1f1   : > { %v1625_v60 = vpop.f32.mrf.mxu0 }
 0x1f3   : > { %v383_v61 = vpop.f32.mrf.mxu0  ;;  %v470_v62 = vpop.f32.mrf.mxu1 }
 0x1f4   : > { %v471_v7 = vadd.f32 %v470_v62, %v380_v59 }
 0x1f5   : > { %v1626_v63 = vpop.f32.mrf.mxu0  ;;  %v1643_v2 = vpop.f32.mrf.mxu1 }
 0x1f7   : > { %v473_v3 = vpop.f32.mrf.mxu1 }
 0x1f9   : > { %v1644_v4 = vpop.f32.mrf.mxu1 }
 0x20b   : > { %v576_v5 = vpop.f32.mrf.mxu0 }
 0x20c   : > { %v582_v9 = vadd.f32 %v576_v5, %v471_v7 }
 0x20d   : > { %v1661_v8 = vpop.f32.mrf.mxu0 }
 0x20f   : > { %v579_v6 = vpop.f32.mrf.mxu0  ;;  %v683_v10 = vpop.f32.mrf.mxu1 }
 0x210   : > { %v689_v11 = vadd.f32 %v683_v10, %v582_v9 }
 0x211   : > { %v1662_v12 = vpop.f32.mrf.mxu0  ;;  %v1679_v13 = vpop.f32.mrf.mxu1 }
 0x212   : > { %690 = vst [vmem:[#allocation4] sm:$0x3] %v689_v11 }
 0x213   : > { %v686_v14 = vpop.f32.mrf.mxu1 }
 0x215   : > { %v1680_v15 = vpop.f32.mrf.mxu1 }
 0x216 PF: > { %p1456_p3 = scmp.le.s32.totalorder %s1965_s19, 0 }
 0x218   : > { %694 = sbr.rel (%p1456_p3) target bundleno = 809 (0x329), region = 48 }
 0x21d   : > { %v1766_v16 = vld [vmem:[%s2023_s11 + $0x78] sm:$0xff]   ;;  %v1770_v20 = vld [vmem:[%s2023_s11 + $0x70] sm:$0xff]   ;;  %v1774_v24 = vld [vmem:[%s2023_s11 + $0x68] sm:$0xff]   ;;  %v705_v44 = vlaneseq  ;;  %v1919_v53 = vmov 1983009808  }
 0x21e   : > { %v1767_v17 = vld [vmem:[%s2023_s11 + $0xf8] sm:$0xff]   ;;  %1543 = vmatprep.subr.bf16.mxu0 %v1766_v16  ;;  %v1771_v21 = vld [vmem:[%s2023_s11 + $0xf0] sm:$0xff]   ;;  %v1775_v25 = vld [vmem:[%s2023_s11 + $0xe8] sm:$0xff]   ;;  %v703_v54 = vunpack.c.l.s4 %v1919_v53 }
 0x21f   : > { %v1768_v18 = vld [vmem:[%s2023_s11 + $0x38] sm:$0xff]   ;;  %1565 = vmatprep.subr.bf16.mxu1 %v1767_v17  ;;  %v1772_v22 = vld [vmem:[%s2023_s11 + $0x30] sm:$0xff]   ;;  %v1776_v26 = vld [vmem:[%s2023_s11 + $0x28] sm:$0xff]   ;;  %v706_v49 = vshrl.u32 %v705_v44, 7 }
 0x220   : > { %v1769_v19 = vld [vmem:[%s2023_s11 + $0xb8] sm:$0xff]   ;;  %1544 = vmatpush3.bf16.msra.mxu0 %v1768_v18  ;;  %v1773_v23 = vld [vmem:[%s2023_s11 + $0xb0] sm:$0xff]   ;;  %v1777_v27 = vld [vmem:[%s2023_s11 + $0xa8] sm:$0xff]   ;;  %v704_v55 = vunpack.c.0.s8 %v703_v54 }
 0x221   : > { %1566 = vmatpush3.bf16.msra.mxu1 %v1769_v19  ;;  %1545 = vmatprep.subr.bf16.mxu0 %v1770_v20  ;;  %v1778_v28 = vld [vmem:[%s2023_s11 + $0x60] sm:$0xff]   ;;  %v1782_v32 = vld [vmem:[%s2023_s11 + $0x58] sm:$0xff]   ;;  %v1786_v36 = vld [vmem:[%s2023_s11 + $0x50] sm:$0xff]  }
 0x222   : > { %1567 = vmatprep.subr.bf16.mxu1 %v1771_v21  ;;  %v1779_v29 = vld [vmem:[%s2023_s11 + $0xe0] sm:$0xff]   ;;  %v1783_v33 = vld [vmem:[%s2023_s11 + $0xd8] sm:$0xff]   ;;  %v1787_v37 = vld [vmem:[%s2023_s11 + $0xd0] sm:$0xff]   ;;  %v707_v57 = vsub.s32 %v704_v55, %v706_v49 }
 0x223   : > { %v1780_v30 = vld [vmem:[%s2023_s11 + $0x20] sm:$0xff]   ;;  %v1784_v34 = vld [vmem:[%s2023_s11 + $0x18] sm:$0xff]   ;;  %v1788_v38 = vld [vmem:[%s2023_s11 + $0x10] sm:$0xff]  }
 0x224   : > { %1546 = vmatpush3.bf16.msra.mxu0 %v1772_v22  ;;  %v1781_v31 = vld [vmem:[%s2023_s11 + $0xa0] sm:$0xff]   ;;  %v1785_v35 = vld [vmem:[%s2023_s11 + $0x98] sm:$0xff]   ;;  %v1789_v39 = vld [vmem:[%s2023_s11 + $0x90] sm:$0xff]  }
 0x225   : > { %1568 = vmatpush3.bf16.msra.mxu1 %v1773_v23  ;;  %1547 = vmatprep.subr.bf16.mxu0 %v1774_v24  ;;  %v1790_v40 = vld [vmem:[%s2023_s11 + $0x48] sm:$0xff]   ;;  %v1794_v45 = vld [vmem:[%s2023_s11 + $0x40] sm:$0xff]   ;;  %v695_v50 = vld [vmem:[#allocation2] sm:$0xff] }
 0x226   : > { %1569 = vmatprep.subr.bf16.mxu1 %v1775_v25  ;;  %v1791_v41 = vld [vmem:[%s2023_s11 + $0xc8] sm:$0xff]   ;;  %v1795_v46 = vld [vmem:[%s2023_s11 + $0xc0] sm:$0xff]   ;;  %v1798_v51 = vld [vmem:[%s2023_s11 + $0x178] sm:$0xff]   ;;  %v697_v52 = vsub.f32 %v2033_v0, %v695_v50 }
 0x227   : > { %v1792_v42 = vld [vmem:[%s2023_s11 + $0x8] sm:$0xff]   ;;  %v1796_v47 = vld [vmem:[%s2023_s11] sm:$0xff]   ;;  %v1799_v4 = vld [vmem:[%s2023_s11 + $0x138] sm:$0xff]  }
 0x228   : > { %1548 = vmatpush3.bf16.msra.mxu0 %v1776_v26  ;;  %v1793_v43 = vld [vmem:[%s2023_s11 + $0x88] sm:$0xff]   ;;  %v1797_v48 = vld [vmem:[%s2023_s11 + $0x80] sm:$0xff]   ;;  %v701_v56 = vcombine.high %v697_v52, %v697_v52  ;;  %v708_v58 = vrot.slane %v697_v52, %v707_v57  ;;  %v1800_v5 = vld [vmem:[%s2023_s11 + $0x170] sm:$0xff]  }
 0x229   : > { %1570 = vmatpush3.bf16.msra.mxu1 %v1777_v27  ;;  %1549 = vmatprep.subr.bf16.mxu0 %v1778_v28  ;;  %v1801_v7 = vld [vmem:[%s2023_s11 + $0x130] sm:$0xff]   ;;  %v1802_v8 = vld [vmem:[%s2023_s11 + $0x168] sm:$0xff]   ;;  %v696_v9 = vld [vmem:[#allocation2 + $0x8] sm:$0xf] }
 0x22a   : > { %1571 = vmatprep.subr.bf16.mxu1 %v1779_v29  ;;  %v715_v59 = vrot.slane %v701_v56, %v707_v57  ;;  %v716_v60 = vcombine.high %v708_v58, %v708_v58  ;;  %v732_v62 = vpack.c.bf16 %v708_v58, %v708_v58  ;;  %v698_v6 = vsub.f32 %v2035_v1, %v696_v9  ;;  %v1803_v10 = vld [vmem:[%s2023_s11 + $0x128] sm:$0xff]   ;;  %v1804_v12 = vld [vmem:[%s2023_s11 + $0x160] sm:$0xff]   ;;  %v1806_v16 = vld [vmem:[%s2023_s11 + $0x158] sm:$0xff]  }
 0x22b   : > { %v1805_v14 = vld [vmem:[%s2023_s11 + $0x120] sm:$0xff]   ;;  %v1807_v17 = vld [vmem:[%s2023_s11 + $0x118] sm:$0xff]   ;;  %v1808_v18 = vld [vmem:[%s2023_s11 + $0x150] sm:$0xff]  }
 0x22c   : > { %1550 = vmatpush3.bf16.msra.mxu0 %v1780_v30  ;;  %v717_v61 = vcombine.high %v715_v59, %v715_v59  ;;  %v734_v63 = vpack.c.bf16 %v715_v59, %v715_v59  ;;  %v733_v2 = vpack.c.bf16 %v716_v60, %v716_v60  ;;  %v724_v11 = vrot.slane %v698_v6, %v707_v57  ;;  %v1809_v19 = vld [vmem:[%s2023_s11 + $0x110] sm:$0xff]   ;;  %v1810_v20 = vld [vmem:[%s2023_s11 + $0x148] sm:$0xff]   ;;  %v1812_v22 = vld [vmem:[%s2023_s11 + $0x140] sm:$0xff]  }
 0x22d   : > { %1572 = vmatpush3.bf16.msra.mxu1 %v1781_v31  ;;  %1551 = vmatprep.subr.bf16.mxu0 %v1782_v32  ;;  %v1811_v21 = vld [vmem:[%s2023_s11 + $0x108] sm:$0xff]   ;;  %v1813_v23 = vld [vmem:[%s2023_s11 + $0x100] sm:$0xff]  }
 0x22e   : > { %1573 = vmatprep.subr.bf16.mxu1 %v1783_v33  ;;  %v735_v3 = vpack.c.bf16 %v717_v61, %v717_v61  ;;  %1155 = vmatprep.mubr.bf16.mxu0 %v733_v2  ;;  %v725_v13 = vcombine.high %v724_v11, %v724_v11  ;;  %v736_v24 = vpack.c.bf16 %v724_v11, %v724_v11 }
 0x230   : > { %1552 = vmatpush3.bf16.msra.mxu0 %v1784_v34  ;;  %1195 = vmatprep.mubr.bf16.mxu1 %v735_v3  ;;  %v737_v15 = vpack.c.bf16 %v725_v13, %v725_v13 }
 0x231   : > { %1574 = vmatpush3.bf16.msra.mxu1 %v1785_v35  ;;  %1553 = vmatprep.subr.bf16.mxu0 %v1786_v36 }
 0x232   : > { %1575 = vmatprep.subr.bf16.mxu1 %v1787_v37 }
 0x234   : > { %1554 = vmatpush3.bf16.msra.mxu0 %v1788_v38 }
 0x235   : > { %1576 = vmatpush3.bf16.msra.mxu1 %v1789_v39  ;;  %1555 = vmatprep.subr.bf16.mxu0 %v1790_v40  ;;  %v738_v39 = vld [vmem:[#allocation3] sm:$0x3] }
 0x236   : > { %1577 = vmatprep.subr.bf16.mxu1 %v1791_v41 }
 0x238   : > { %1556 = vmatpush3.bf16.msra.mxu0 %v1792_v42 }
 0x239   : > { %1578 = vmatpush3.bf16.msra.mxu1 %v1793_v43  ;;  %1557 = vmatprep.subr.bf16.mxu0 %v1794_v45 }
 0x23a   : > { %1579 = vmatprep.subr.bf16.mxu1 %v1795_v46 }
 0x23c   : > { %1558 = vmatpush3.bf16.msra.mxu0 %v1796_v47 }
 0x23d   : > { %1580 = vmatpush3.bf16.msra.mxu1 %v1797_v48  ;;  %1587 = vmatprep.subr.bf16.mxu0 %v1798_v51 }
 0x23f   : > { %1156 = vmatmul.mubr.bf16.vlgmr.msra.gmra.mxu0 %v732_v62 }
 0x240   : > { %1196 = vmatmul.mubr.bf16.vlgmr.msra.gmra.mxu1 %v734_v63  ;;  %1588 = vmatpush3.bf16.msra.mxu0 %v1799_v4 }
 0x241   : > { %1589 = vmatprep.subr.bf16.mxu0 %v1800_v5  ;;  %1235 = vmatprep.mubr.bf16.mxu0 %v737_v15 }
 0x244   : > { %1590 = vmatpush3.bf16.msra.mxu0 %v1801_v7 }
 0x245   : > { %1591 = vmatprep.subr.bf16.mxu0 %v1802_v8 }
 0x248   : > { %1592 = vmatpush3.bf16.msra.mxu0 %v1803_v10 }
 0x249   : > { %1593 = vmatprep.subr.bf16.mxu0 %v1804_v12 }
 0x24c   : > { %1594 = vmatpush3.bf16.msra.mxu0 %v1805_v14 }
 0x24d   : > { %1595 = vmatprep.subr.bf16.mxu0 %v1806_v16 }
 0x250   : > { %1596 = vmatpush3.bf16.msra.mxu0 %v1807_v17 }
 0x251   : > { %1597 = vmatprep.subr.bf16.mxu0 %v1808_v18 }
 0x254   : > { %1598 = vmatpush3.bf16.msra.mxu0 %v1809_v19 }
 0x255   : > { %1599 = vmatprep.subr.bf16.mxu0 %v1810_v20 }
 0x258   : > { %1600 = vmatpush3.bf16.msra.mxu0 %v1811_v21 }
 0x259   : > { %1601 = vmatprep.subr.bf16.mxu0 %v1812_v22 }
 0x25c   : > { %1602 = vmatpush3.bf16.msra.mxu0 %v1813_v23 }
 0x25f   : > { %1236 = vmatmul.mubr.bf16.vlgmr.msra.gmra.mxu0 %v736_v24 }
 0x2ff   : > { %v1559_v25 = vpop.f32.mrf.mxu0 }
 0x300   : > { %v1581_v26 = vpop.f32.mrf.mxu1 }
 0x301   : > { %v1560_v27 = vpop.f32.mrf.mxu0 }
 0x302   : > { %v1582_v28 = vpop.f32.mrf.mxu1  ;;  %v1561_v33 = vadd.f32 %v1560_v27, %v1559_v25 }
 0x303   : > { %v1562_v29 = vpop.f32.mrf.mxu0  ;;  %v1583_v34 = vadd.f32 %v1582_v28, %v1581_v26 }
 0x304   : > { %v1584_v30 = vpop.f32.mrf.mxu1 }
 0x305   : > { %v1563_v31 = vpop.f32.mrf.mxu0  ;;  %v1198_v37 = vadd.f32 %v1583_v34, %v1561_v33 }
 0x306   : > { %v1585_v32 = vpop.f32.mrf.mxu1 }
 0x31f   : > { %v1603_v35 = vpop.f32.mrf.mxu0 }
 0x321   : > { %v1604_v36 = vpop.f32.mrf.mxu0 }
 0x322   : > { %v1605_v38 = vadd.f32 %v1604_v36, %v1603_v35 }
 0x323   : > { %v1606_v40 = vpop.f32.mrf.mxu0 }
 0x324   : > { %v1238_v41 = vadd.f32 %v1605_v38, %v1198_v37 }
 0x325   : > { %v1607_v42 = vpop.f32.mrf.mxu0 }
 0x326   : > { %v1243_v43 = vadd.f32 %v1238_v41, %v738_v39 }
 0x328   : > { %1244 = vst [vmem:[#allocation3] sm:$0x3] %v1243_v43 }
 0x329 PF: > { %1245 = vst [vmem:[#allocation2] sm:$0xff] %v2033_v0  ;;  %1246 = vst [vmem:[#allocation2 + $0x8] sm:$0xf] %v2035_v1  ;;  %p1505_p4 = scmp.ne.s32.totalorder %s1965_s19, 4 }
 0x32b   : > { %1250 = sbr.rel (%p1505_p4) target bundleno = 1207 (0x4b7), region = 52 }
 0x330   : > { %v1251_v44 = vld [vmem:[#allocation4] sm:$0x3]  ;;  %vm1254_vm3 = vcmask 1041408   ;;  %v1252_v45 = vld [vmem:[#allocation3] sm:$0x3]  ;;  %vm1286_vm8 = vcmask 1024  }
 0x331   : > { %v1258_v46 = vmul.f32 %v1251_v44, %v1251_v44  ;;  %v1269_v47 = vmul.f32 %v1252_v45, %v1252_v45  ;;  %v1253_v48 = vmul.f32 %v1252_v45, %v1251_v44  ;;  %vm1301_vm9 = vcmask 0  }
 0x333   : > { %v1259_v49 = vsel %vm1254_vm3, %v1258_v46, 0.0  ;;  %v1255_v50 = vsel %vm1254_vm3, %v1253_v48, 0.0  ;;  %v1270_v51 = vsel %vm1254_vm3, %v1269_v47, 0.0 }
 0x334   : > { %1260 = vadd.xlane.f32.xlu0 %v1259_v49  ;;  %1256 = vadd.xlane.f32.xlu1 %v1255_v50 }
 0x338   : > { %1271 = vadd.xlane.f32.xlu0 %v1270_v51 }
 0x3bd   : > { %v1261_v52 = vpop.xlane.xlu0 %1260  ;;  %v1257_v3 = vpop.xlane.xlu1 %1256 }
 0x3be   : > { %1814 = vrsqrt.f32 %v1261_v52  ;;  %vm1264_vm4 = vcmp.eq.f32.partialorder %v1261_v52, inf  ;;  %v1267_v56 = vand.u32 2147483648, %v1261_v52  ;;  %vm1266_vm5 = vcmp.eq.f32.partialorder %v1261_v52, 0.0 }
 0x3c1   : > { %v1272_v0 = vpop.xlane.xlu0 %1271 }
 0x3c2   : > { %1816 = vrsqrt.f32 %v1272_v0  ;;  %vm1275_vm6 = vcmp.eq.f32.partialorder %v1272_v0, inf  ;;  %v1278_v59 = vand.u32 2147483648, %v1272_v0  ;;  %vm1277_vm7 = vcmp.eq.f32.partialorder %v1272_v0, 0.0 }
 0x3cb   : > { %v1815_v1 = vpop.eup %1814 }
 0x3cc   : > { %v1263_v53 = vmul.f32 %v1815_v1, %v1261_v52 }
 0x3ce   : > { %v1265_v54 = vsel %vm1264_vm4, %v1261_v52, %v1263_v53 }
 0x3cf   : > { %v1817_v55 = vpop.eup %1816  ;;  %v1268_v58 = vsel %vm1266_vm5, %v1267_v56, %v1265_v54 }
 0x3d0   : > { %v1274_v57 = vmul.f32 %v1817_v55, %v1272_v0  ;;  %v1280_v62 = vmax.f32 %v1268_v58, 1e-08 }
 0x3d2   : > { %v1276_v60 = vsel %vm1275_vm6, %v1272_v0, %v1274_v57 }
 0x3d3   : > { %v1279_v61 = vsel %vm1277_vm7, %v1278_v59, %v1276_v60 }
 0x3d4   : > { %v1281_v63 = vmax.f32 %v1279_v61, 1e-08 }
 0x3d6   : > { %v1282_v2 = vmul.f32 %v1281_v63, %v1280_v62 }
 0x3d8   : > { %1818 = vrcp.f32 %v1282_v2 }
 0x3e5   : > { %v1819_v4 = vpop.eup %1818 }
 0x3e6   : > { %v1284_v5 = vmul.f32 %v1819_v4, %v1257_v3 }
 0x3e8   : > { %v1285_v7 = vsub.f32 1.0, %v1284_v5 }
 0x3ea   : > { %v1287_v8 = vsel %vm1286_vm8, %v1285_v7, 0.0 }
 0x3eb   : > { %1288 = vadd.xlane.f32.xlu1 %v1287_v8 }
 0x474   : > { %v1289_v9 = vpop.xlane.xlu1 %1288 }
 0x475   : > { %v1290_v6 = vrot.slane %v1289_v9, 4 }
 0x477   : > { %v1291_v10 = vadd.f32 %v1290_v6, %v1289_v9 }
 0x479   : > { %v1292_v11 = vrot.slane %v1291_v10, 2 }
 0x47b   : > { %v1293_v12 = vadd.f32 %v1292_v11, %v1291_v10 }
 0x47d   : > { %v1294_v13 = vrot.slane %v1293_v12, 1 }
 0x47f   : > { %v1295_v14 = vadd.f32 %v1294_v13, %v1293_v12 }
 0x481   : > { %1683 = vpush %v1295_v14 }
 0x4b2   : > { %s1684_s11 = spop %1683 }
 0x4b3   : > { %s1299_s26 = smul.f32 0.5, %s1684_s11 }
 0x4b5   : > { %v1300_v15 = vstv %s1299_s26 }
 0x4b6   : > { %1302 = vst.msk [vmem:[#allocation8] sm:$0x1] %vm1301_vm9, %v1300_v15 }
 0x4b7 PF: > { %p1696_p5 = scmp.eq.s32.totalorder %s1965_s19, 4  ;;  %s1920_s14 = smov [#allocation8]  }
 0x4b8   : > { %s1310_s15 = sshll.u32 %s1920_s14, 4  ;;  %s1311_s15 = int_to_ptr.vmem [resolvable:$true] %s1310_s15 }
 0x4b9   : > { %s1848_s21 = scalar_lea.vmem %s1311_s15, 16  ;;  %s1854_s22 = scalar_lea.vmem %s1311_s15, 32 }
 0x4ba   : > { %p1849_p6 = scmp.ne.s32.totalorder %s1311_s15, %s1848_s21  ;;  %p1855_p11 = scmp.lt.s32.totalorder %s1311_s15, %s1311_s15 }
 0x4bb   : > { %p1856_p13 = scmp.lt.s32.totalorder %s1854_s22, %s1848_s21 }
 0x4bc   : > { %p1850_p7 = pnand %p1849_p6, %p1696_p5 }
 0x4bd   : > { %p1857_p12 = por %p1856_p13, %p1855_p11 }
 0x4be   : > { %p1851_p9 = pneg %p1850_p7 }
 0x4c0   : > { %p1858_p0 = pnand %p1857_p12, %p1851_p9 }
 0x4c2   : > { %1861 = shalt.err (!%p1858_p0)
}
 0x4c3   : > { %1688 = dma.vmem_to_hbm [thread:$0]  (%p1696_p5), %s1311_s15, 16, %s2256_s4, [#allocation7]  }
 0x4c4   : > { %1893 = dma.done.wait (%p1696_p5), [#allocation7], 16  }
 0x4c5   : > { %1895 = vsyncadd (%p1696_p5), [#allocation7], 4294967280 }
 0x4c6 PF: > { %p15_p1 = scmp.ge.s32.totalorder %s1968_s20, 7   ;;  %s2261_s15 = smov %s1902_s16 }
 0x4c7   : > { %s2262_s16 = smov %s1906_s17  ;;  %s2263_s17 = smov %s1980_s25 }
 0x4c8   : > { %s2264_s18 = smov %s1968_s20  ;;  %17 = sbr.rel (!%p15_p1) target bundleno = 4 (0x4), region = 91 }
 0x4cd   :  { %1323 = vsyncpa [#allocation6], 1 }
 0x4ce   :  { %1325 = vsyncpa [#allocation6 + $0x1], 1 }
 0x4cf   :  { %1326 = vsyncpa [#allocation7], 1 }
 0x4d0   :  { %1328 = vsyncpa [#allocation7 + $0x1], 1 }

</bundles_post_ra>
